<compile_context>
chip_gen: v5e
topology: v5e:2x2
jax: 0.10.0
libtpu: 0.0.40
codegen_flags: <defaults>
</compile_context>

<pallas_src>
import functools

import jax
import jax.numpy as jnp
from jax import lax
from jax.experimental import pallas as pl
from jax.experimental.pallas import tpu as pltpu


_NUM_CORE_SPLIT = 2      # v7x has 2 TensorCores; extra axis is harmless on v5e/v6e.
_CHUNK = 512             # inner segment-sum chunk (nodes per one-hot / MXU push)
_ACC_ROWS = 8            # native sublane count; row 0 = |err| sums, row 1 = counts


def _round_up(v, m):
    return ((v + m - 1) // m) * m


def _choose_tiling(n, f, itemsize, tile_n_max):
    """Pick a node tile (multiple of 128, multiple of _CHUNK when > _CHUNK) under a
    conservative ~12 MiB VMEM budget that is safe on every TPU generation."""
    tile_n_max = max(128, (int(tile_n_max) // 128) * 128)
    n_lanes = _round_up(max(n, 1), 128)
    budget = 12 * 1024 * 1024
    # double-buffered pred+target streams + lane-padded (tile_n, 1) int32 id column
    per_node = 2 * 2 * f * itemsize + 2 * 128 * 4
    cap = max(128, (budget // per_node) // 128 * 128)
    tile_n = min(n_lanes, tile_n_max, cap)
    if tile_n > _CHUNK:
        tile_n = (tile_n // _CHUNK) * _CHUNK
    chunk = min(_CHUNK, tile_n)
    return tile_n, chunk


def _graph_mae_partial_kernel(pred_ref, target_ref, batch_ref, out_ref, *,
                              chunk, num_chunks, g_pad):
    """Accumulates per-graph |err| sums (row 0) and node counts (row 1) into the
    resident (8, g_pad) output block owned by this core."""
    i = pl.program_id(1)

    @pl.when(i == 0)
    def _init():
        out_ref[...] = jnp.zeros_like(out_ref)

    # Hoisted loop invariants (JAX does not CSE broadcast_in_dim).
    g_iota = lax.broadcasted_iota(jnp.int32, (chunk, g_pad), 1)
    ones_row = jnp.ones((1, chunk), jnp.float32)
    zero_rows = jnp.zeros((_ACC_ROWS - 2, chunk), jnp.float32)

    # Statically unrolled chunk loop (num_chunks <= 16): bounds the live one-hot
    # intermediate to (chunk, g_pad) instead of (tile_n, g_pad).
    for c in range(num_chunks):
        lo = c * chunk
        hi = lo + chunk
        p = pred_ref[:, lo:hi].astype(jnp.float32)        # (F, chunk)  lane-dense
        t = target_ref[:, lo:hi].astype(jnp.float32)      # (F, chunk)
        err = jnp.sum(jnp.abs(p - t), axis=0, keepdims=True)            # (1, chunk)
        lhs = jnp.concatenate([err, ones_row, zero_rows], axis=0)       # (8, chunk)

        ids = batch_ref[lo:hi, :]                                       # (chunk, 1)
        # Padded nodes carry id -1 and never match a one-hot column.
        onehot = (ids == g_iota).astype(jnp.float32)                    # (chunk, g_pad)

        # One MXU matmul yields both accumulators: rows 0/1 of the result are the
        # per-graph |err| sums and node counts for this chunk.
        out_ref[...] += jnp.dot(lhs, onehot, preferred_element_type=jnp.float32)


def graph_mae_loss(pred, target, batch=None, x=None, *,
                   max_graphs=128, tile_n_max=8192):
    """Pallas TPU implementation of GraphMAELoss.forward(pred, target, batch, x).

    `max_graphs` must be >= the true number of graphs (otherwise the result is NaN).
    `x` is unused (matches the torch module). jit-safe (no host syncs).
    """
    del x  # unused by GraphMAELoss.forward
    pred = jnp.asarray(pred)
    target = jnp.asarray(target)
    if not jnp.issubdtype(pred.dtype, jnp.floating):
        pred = pred.astype(jnp.float32)
    if not jnp.issubdtype(target.dtype, jnp.floating):
        target = target.astype(jnp.float32)
    if pred.ndim == 1:
        pred = pred[:, None]
    if target.ndim == 1:
        target = target[:, None]
    n, f = pred.shape

    graph_mode = batch is not None
    if graph_mode:
        batch = jnp.asarray(batch, jnp.int32)
        num_graphs = jnp.max(batch).astype(jnp.int32) + 1   # stays on device
    else:
        batch = jnp.zeros((n,), jnp.int32)
        num_graphs = jnp.int32(1)

    g_pad = _round_up(max_graphs, 128)
    tile_n, chunk = _choose_tiling(n, f, pred.dtype.itemsize, tile_n_max)
    num_chunks = tile_n // chunk
    n_lanes = _round_up(n, 128)
    tiles_total = -(-n_lanes // tile_n)
    tpc = -(-tiles_total // _NUM_CORE_SPLIT)                # tiles per core
    n_total = _NUM_CORE_SPLIT * tpc * tile_n

    # Feature-on-sublane / node-on-lane streams; zero-padded nodes contribute 0.
    pred_t = jnp.pad(pred.T, ((0, 0), (0, n_total - n)))
    target_t = jnp.pad(target.T, ((0, 0), (0, n_total - n)))
    # Graph-id column; padded rows get id -1 so they never match any graph.
    batch_col = jnp.pad(batch, (0, n_total - n), constant_values=-1)[:, None]

    kernel = functools.partial(_graph_mae_partial_kernel,
                               chunk=chunk, num_chunks=num_chunks, g_pad=g_pad)

    grid_spec = pltpu.PrefetchScalarGridSpec(
        num_scalar_prefetch=0,
        grid=(_NUM_CORE_SPLIT, tpc),                        # (core-split, node tiles)
        in_specs=[
            pl.BlockSpec((f, tile_n), lambda c, i, tpc=tpc: (0, c * tpc + i)),  # pred
            pl.BlockSpec((f, tile_n), lambda c, i, tpc=tpc: (0, c * tpc + i)),  # target
            pl.BlockSpec((tile_n, 1), lambda c, i, tpc=tpc: (c * tpc + i, 0)),  # ids
        ],
        out_specs=pl.BlockSpec((_ACC_ROWS, g_pad), lambda c, i: (c, 0)),
    )

    partials = pl.pallas_call(
        kernel,
        out_shape=jax.ShapeDtypeStruct((_NUM_CORE_SPLIT * _ACC_ROWS, g_pad),
                                       jnp.float32),
        grid_spec=grid_spec,
        compiler_params=pltpu.CompilerParams(
            dimension_semantics=("parallel", "arbitrary"),
            vmem_limit_bytes=32 * 1024 * 1024),
    )(pred_t, target_t, batch_col)

    # Tiny O(G) finalize in plain JAX (merges the per-core partials).
    parts = partials.reshape(_NUM_CORE_SPLIT, _ACC_ROWS, g_pad)
    totals = jnp.sum(parts, axis=0)                         # (8, g_pad)
    err_sum = totals[0]                                     # per-graph sum|err|
    cnt = totals[1]                                         # per-graph node count

    if graph_mode:
        valid = jnp.arange(g_pad) < num_graphs
        # 0/0 -> NaN for empty-but-valid graphs, matching torch.mean of empty tensor.
        mae_g = jnp.where(valid, err_sum / (cnt * jnp.float32(f)), jnp.float32(0.0))
        loss = jnp.sum(mae_g) / num_graphs.astype(jnp.float32) * jnp.float32(10000.0)
        # Guard: if num_graphs > max_graphs the kernel would silently drop graphs.
        loss = jnp.where(num_graphs <= g_pad, loss, jnp.float32(jnp.nan))
    else:
        loss = jnp.sum(err_sum) / jnp.float32(n * f)
    return loss


def _reference_graph_mae(pred, target, batch):
    """Pure-JAX mirror of the torch forward (batch given)."""
    num_graphs = int(batch.max()) + 1
    losses = []
    for i in range(num_graphs):
        m = batch == i
        losses.append(jnp.mean(jnp.abs(pred[m] - target[m])))
    return jnp.mean(jnp.stack(losses)) * 10000.0


if __name__ == "__main__":
    key = jax.random.PRNGKey(0)
    k1, k2, k3, k4, k5 = jax.random.split(key, 5)

    # Small case: 16 nodes, 3 prediction dims, 2 graphs of 8 nodes; x (node feats) unused.
    N, F, C = 16, 3, 6
    pred = jax.random.normal(k1, (N, F), jnp.float32)
    target = jax.random.normal(k2, (N, F), jnp.float32)
    x = jax.random.normal(k3, (N, C), jnp.float32)
    batch = jnp.array([0] * 8 + [1] * 8, jnp.int32)

    # graph mode, under jit (no host sync / recompile on num_graphs)
    loss_fn = jax.jit(lambda p, t, b, xx: graph_mae_loss(p, t, b, xx))
    loss = jax.block_until_ready(loss_fn(pred, target, batch, x))
    expected = _reference_graph_mae(pred, target, batch)
    assert jnp.allclose(loss, expected, rtol=1e-5, atol=1e-2), (float(loss), float(expected))

    # Larger ragged case: exercises node padding, multi-chunk tiles and 5 graphs.
    N2 = 1000
    sizes = [100, 200, 300, 250, 150]
    batch2 = jnp.concatenate(
        [jnp.full((s,), i, jnp.int32) for i, s in enumerate(sizes)])
    pred2 = jax.random.normal(k4, (N2, F), jnp.float32)
    target2 = jax.random.normal(k5, (N2, F), jnp.float32)
    loss2 = jax.block_until_ready(graph_mae_loss(pred2, target2, batch2, None))
    expected2 = _reference_graph_mae(pred2, target2, batch2)
    assert jnp.allclose(loss2, expected2, rtol=1e-4, atol=1e-1), (
        float(loss2), float(expected2))

    # batch=None path: plain MAE, no *10000
    loss_none = jax.block_until_ready(graph_mae_loss(pred, target, None, x))
    expected_none = jnp.mean(jnp.abs(pred - target))
    assert jnp.allclose(loss_none, expected_none, rtol=1e-5, atol=1e-6), (
        float(loss_none), float(expected_none))

    print("KERNEL_OK")
</pallas_src>

<mosaic_0001>
module attributes {stable_mosaic.version = 11 : i64} {
  func.func @_graph_mae_partial_kernel(%arg0: i32, %arg1: i32, %arg2: memref<3x128xf32, #tpu.memory_space<vmem>>, %arg3: memref<3x128xf32, #tpu.memory_space<vmem>>, %arg4: memref<128x1xi32, #tpu.memory_space<vmem>>, %arg5: memref<8x128xf32, #tpu.memory_space<vmem>>) attributes {dimension_semantics = [#tpu.dimension_semantics<parallel>, #tpu.dimension_semantics<arbitrary>], iteration_bounds = array<i64: 2, 1>, scalar_prefetch = 0 : i64, scratch_operands = 0 : i64, tpu.core_type = #tpu.core_type<tc>, window_params = [{transform_indices = @transform_0, window_bounds = array<i64: 3, 128>}, {transform_indices = @transform_1, window_bounds = array<i64: 3, 128>}, {transform_indices = @transform_2, window_bounds = array<i64: 128, 1>}, {transform_indices = @transform_3, window_bounds = array<i64: 8, 128>}]} {
    %c0_i32 = arith.constant 0 : i32
    %0 = arith.cmpi eq, %arg1, %c0_i32 : i32
    %1 = arith.extui %0 : i1 to i32
    %c0_i32_0 = arith.constant 0 : i32
    %2 = arith.cmpi ne, %1, %c0_i32_0 : i32
    scf.if %2 {
      %cst_13 = arith.constant 0.000000e+00 : f32
      %22 = vector.broadcast %cst_13 : f32 to vector<8x128xf32>
      %c0_14 = arith.constant 0 : index
      %c0_15 = arith.constant 0 : index
      %23 = vector.load %arg5[%c0_14, %c0_15] : memref<8x128xf32, #tpu.memory_space<vmem>>, vector<8x128xf32>
      tpu.vector_store %arg5[%c0_14, %c0_15], %22 {strides = array<i32>} : memref<8x128xf32, #tpu.memory_space<vmem>>, vector<8x128xf32>,
    } else {
    }
    %3 = tpu.iota {dimensions = array<i32: 1>} : vector<128x128xi32>
    %cst = arith.constant 1.000000e+00 : f32
    %4 = vector.broadcast %cst : f32 to vector<1x128xf32>
    %cst_1 = arith.constant 0.000000e+00 : f32
    %5 = vector.broadcast %cst_1 : f32 to vector<6x128xf32>
    %c0 = arith.constant 0 : index
    %c0_2 = arith.constant 0 : index
    %6 = vector.load %arg2[%c0, %c0_2] : memref<3x128xf32, #tpu.memory_space<vmem>>, vector<3x128xf32>
    %c0_3 = arith.constant 0 : index
    %c0_4 = arith.constant 0 : index
    %7 = vector.load %arg3[%c0_3, %c0_4] : memref<3x128xf32, #tpu.memory_space<vmem>>, vector<3x128xf32>
    %8 = arith.subf %6, %7 : vector<3x128xf32>
    %9 = math.absf %8 : vector<3x128xf32>
    %cst_5 = arith.constant dense<0.000000e+00> : vector<128xf32>
    %10 = vector.multi_reduction <add>, %9, %cst_5 [0] : vector<3x128xf32> to vector<128xf32>
    %11 = vector.shape_cast %10 : vector<128xf32> to vector<1x128xf32>
    %12 = tpu.concatenate %11, %4, %5 in 0 : vector<1x128xf32>, vector<1x128xf32>, vector<6x128xf32> -> vector<8x128xf32>
    %c0_6 = arith.constant 0 : index
    %c0_7 = arith.constant 0 : index
    %13 = vector.load %arg4[%c0_6, %c0_7] : memref<128x1xi32, #tpu.memory_space<vmem>>, vector<128x1xi32>
    %14 = vector.broadcast %13 : vector<128x1xi32> to vector<128x128xi32>
    %15 = arith.cmpi eq, %14, %3 : vector<128x128xi32>
    %16 = arith.extui %15 : vector<128x128xi1> to vector<128x128xi32>
    %17 = arith.sitofp %16 : vector<128x128xi32> to vector<128x128xf32>
    %c0_8 = arith.constant 0 : index
    %c0_9 = arith.constant 0 : index
    %18 = vector.load %arg5[%c0_8, %c0_9] : memref<8x128xf32, #tpu.memory_space<vmem>>, vector<8x128xf32>
    %cst_10 = arith.constant dense<0.000000e+00> : vector<8x128xf32>
    %19 = tpu.matmul %12, %17, %cst_10 {dimension_numbers = #tpu.dot_dimension_numbers<[1], [0], [0], [1], [0, 0, 1, 1], [], []>} : vector<8x128xf32>, vector<128x128xf32>, vector<8x128xf32> -> vector<8x128xf32>
    %20 = arith.addf %18, %19 : vector<8x128xf32>
    %c0_11 = arith.constant 0 : index
    %c0_12 = arith.constant 0 : index
    %21 = vector.load %arg5[%c0_11, %c0_12] : memref<8x128xf32, #tpu.memory_space<vmem>>, vector<8x128xf32>
    tpu.vector_store %arg5[%c0_11, %c0_12], %20 {strides = array<i32>} : memref<8x128xf32, #tpu.memory_space<vmem>>, vector<8x128xf32>,
    return
  }
  func.func @transform_0(%arg0: i32, %arg1: i32) -> (i32, i32) {
    %c1_i32 = arith.constant 1 : i32
    %0 = arith.muli %arg0, %c1_i32 : i32
    %1 = arith.addi %0, %arg1 : i32
    %c0_i32 = arith.constant 0 : i32
    %c0_i32_0 = arith.constant 0 : i32
    return %c0_i32, %1 : i32, i32
  }
  func.func @transform_1(%arg0: i32, %arg1: i32) -> (i32, i32) {
    %c1_i32 = arith.constant 1 : i32
    %0 = arith.muli %arg0, %c1_i32 : i32
    %1 = arith.addi %0, %arg1 : i32
    %c0_i32 = arith.constant 0 : i32
    %c0_i32_0 = arith.constant 0 : i32
    return %c0_i32, %1 : i32, i32
  }
  func.func @transform_2(%arg0: i32, %arg1: i32) -> (i32, i32) {
    %c1_i32 = arith.constant 1 : i32
    %0 = arith.muli %arg0, %c1_i32 : i32
    %1 = arith.addi %0, %arg1 : i32
    %c0_i32 = arith.constant 0 : i32
    %c0_i32_0 = arith.constant 0 : i32
    return %1, %c0_i32 : i32, i32
  }
  func.func @transform_3(%arg0: i32, %arg1: i32) -> (i32, i32) {
    %c0_i32 = arith.constant 0 : i32
    %c0_i32_0 = arith.constant 0 : i32
    return %arg0, %c0_i32 : i32, i32
  }
}

</mosaic_0001>

<bundles_post_ra>
// kernel: _lambda_.1
= control target key start
LH: loop header
LB: loop body
LE: loop exit
PB: predicated region body
PF: predicated region fallthrough
CT: control target
= control target key end

     0   :  { %s602_s12 = smov 0   ;;  %s604_s13 = smov 0   ;;  %s686_s0 = inlined_call_operand.vmem [shape: f32[3,256], index: 0, kind: input, shape index: {}]   ;;  %s687_s1 = inlined_call_operand.vmem [shape: f32[3,256], index: 1, kind: input, shape index: {}]   ;;  %s688_s2 = inlined_call_operand.vmem [shape: s32[256,1], index: 2, kind: input, shape index: {}]   ;;  %s689_s3 = inlined_call_operand.vmem [shape: f32[16,128], index: 3, kind: output, shape index: {}]  }
   0x1   :  { %s606_s14 = smov 0  }
   0x2 LB: > { %s25_s15 = sadd.s32 1, %s574_s13  ;;  %p485_p0 = scmp.ge.s32.totalorder %s578_s14, 1  ;;  %s578_s14 = sphi %s606_s14, %s13_s14   ;;  %s574_s13 = sphi %s604_s13, %s691_s13   ;;  %s570_s12 = sphi %s602_s12, %s690_s12  }
   0x3   : > { %p27_p1 = scmp.ge.s32.totalorder %s25_s15, 2  ;;  %p180_p2 = scmp.lt.s32.totalorder %s578_s14, 3 }
   0x5   : > { %s693_s15 = smov (%p27_p1, %s25_s15), 0  ;;  %p181_p3 = pnand %p485_p0, %p180_p2 }
   0x6   : > { %s488_s16 = sshll.u32 (!%p181_p3), %s570_s12, 4  ;;  %p215_p5 = scmp.lt.s32.totalorder (!%p181_p3), %s570_s12, 1 }
   0x7   : > { %184 = sbr.rel (%p181_p3) target bundleno = 300 (0x12c), region = 32  ;;  %p228_p4 = scmp.lt.s32.totalorder (!%p181_p3), %s488_s16, 31 }
   0xc   : > { %v580_v0 = vmov 0   ;;  %s695_s16 = smov (!%p228_p4, %s488_s16), 31  ;;  %s697_s12 = smov (!%p215_p5, %s570_s12), 1  ;;  %v243_v17 = vlaneseq  ;;  %v581_v22 = vmov 1.0   ;;  %vm249_vm2 = vcmask 1042432  }
   0xd   : > { %555 = vset.pattern.permute.xlu2 %v580_v0  ;;  %554 = vset.pattern.permute.xlu1 %v580_v0  ;;  %s489_s17 = sshll.u32 %s695_s16, 3  ;;  %s486_s21 = sshll.u32 %s697_s12, 2 }
   0xe   : > { %553 = vset.pattern.permute.xlu0 %v580_v0  ;;  %s626_s20 = scalar_lea.vmem %s688_s2, %s489_s17  ;;  %v649_v19 = vand.u32 127, %v243_v17  ;;  %s218_s24 = scalar_lea.vmem %s686_s0, %s486_s21 }
   0xf   : > { %v276_v1 = vld [vmem:[%s626_s20 + $0x78] sm:$0xff]  ;;  %v274_v2 = vld [vmem:[%s626_s20 + $0x68] sm:$0xff]  ;;  %v275_v4 = vld [vmem:[%s626_s20 + $0x70] sm:$0xff]  ;;  %s224_s27 = scalar_lea.vmem %s687_s1, %s486_s21  ;;  %s490_s28 = sshll.u32 %s697_s12, 3 }
  0x10   : > { %v272_v3 = vld [vmem:[%s626_s20 + $0x58] sm:$0xff]  ;;  %323 = vperm.xlu0 %553, %v276_v1   ;;  %317 = vperm.xlu1 %554, %v274_v2   ;;  %v273_v5 = vld [vmem:[%s626_s20 + $0x60] sm:$0xff]  ;;  %v271_v6 = vld [vmem:[%s626_s20 + $0x50] sm:$0xff]  ;;  %s237_s4 = scalar_lea.vmem %s689_s3, %s490_s28 }
  0x11   : > { %311 = vperm.xlu2 %555, %v272_v3   ;;  %v270_v7 = vld [vmem:[%s626_s20 + $0x48] sm:$0xff]  ;;  %v269_v8 = vld [vmem:[%s626_s20 + $0x40] sm:$0xff]  ;;  %v268_v9 = vld [vmem:[%s626_s20 + $0x38] sm:$0xff] }
  0x12   : > { %v267_v10 = vld [vmem:[%s626_s20 + $0x30] sm:$0xff]  ;;  %v266_v11 = vld [vmem:[%s626_s20 + $0x28] sm:$0xff]  ;;  %v265_v12 = vld [vmem:[%s626_s20 + $0x20] sm:$0xff] }
  0x13   : > { %v264_v13 = vld [vmem:[%s626_s20 + $0x18] sm:$0xff]  ;;  %v263_v14 = vld [vmem:[%s626_s20 + $0x10] sm:$0xff]  ;;  %v262_v15 = vld [vmem:[%s626_s20 + $0x8] sm:$0xff] }
  0x14   : > { %v261_v16 = vld [vmem:[%s626_s20] sm:$0xff] }
  0x15   : > { %v245_v23 = vld [vmem:[%s218_s24] sm:$0x7] }
  0x16   : > { %v246_v24 = vld [vmem:[%s224_s27] sm:$0x7] }
  0x17   : > { %v247_v26 = vsub.f32 %v245_v23, %v246_v24 }
  0x18   : > { %320 = vperm.xlu0 %553, %v275_v4   ;;  %314 = vperm.xlu1 %554, %v273_v5  }
  0x19   : > { %308 = vperm.xlu2 %555, %v271_v6   ;;  %v248_v29 = vand.u32 2147483647, %v247_v26 }
  0x1b   : > { %v250_v31 = vsel %vm249_vm2, %v248_v29, 0.0 }
  0x1c   : > { %v251_v34 = vrot.slane %v250_v31, 4 }
  0x1e   : > { %v252_v35 = vadd.f32 %v251_v34, %v250_v31 }
  0x20   : > { %305 = vperm.xlu0 %553, %v270_v7   ;;  %302 = vperm.xlu1 %554, %v269_v8   ;;  %v253_v39 = vrot.slane %v252_v35, 2 }
  0x21   : > { %299 = vperm.xlu2 %555, %v268_v9  }
  0x22   : > { %v254_v40 = vadd.f32 %v253_v39, %v252_v35 }
  0x24   : > { %v255_v43 = vrot.slane %v254_v40, 1 }
  0x26   : > { %v256_v45 = vadd.f32 %v255_v43, %v254_v40 }
  0x28   : > { %296 = vperm.xlu0 %553, %v267_v10   ;;  %293 = vperm.xlu1 %554, %v266_v11  }
  0x29   : > { %290 = vperm.xlu2 %555, %v265_v12  }
  0x30   : > { %287 = vperm.xlu0 %553, %v264_v13   ;;  %284 = vperm.xlu1 %554, %v263_v14  }
  0x31   : > { %281 = vperm.xlu2 %555, %v262_v15  }
  0x38   : > { %278 = vperm.xlu0 %553, %v261_v16  }
  0x6b   : > { %v312_v18 = vpop.permute.xlu2 %311 }
  0x6c   : > { %vm336_vm5 = vcmp.eq.s32.totalorder %v312_v18, %v649_v19 }
  0x73   : > { %v309_v25 = vpop.permute.xlu2 %308 }
  0x74   : > { %vm335_vm6 = vcmp.eq.s32.totalorder %v309_v25, %v649_v19 }
  0x7b   : > { %v300_v30 = vpop.permute.xlu2 %299 }
  0x7c   : > { %vm332_vm9 = vcmp.eq.s32.totalorder %v300_v30, %v649_v19 }
  0x82   : > { %v324_v20 = vpop.permute.xlu0 %323  ;;  %v318_v21 = vpop.permute.xlu1 %317 }
  0x83   : > { %vm340_vm0 = vcmp.eq.s32.totalorder %v324_v20, %v649_v19  ;;  %vm338_vm3 = vcmp.eq.s32.totalorder %v318_v21, %v649_v19  ;;  %v291_v36 = vpop.permute.xlu2 %290 }
  0x84   : > { %507 = vmatpush.msk.msra.mxu0 %vm340_vm0, %v581_v22  ;;  %vm329_vm12 = vcmp.eq.s32.totalorder %v291_v36, %v649_v19  ;;  %vm257_vm0 = vcmask 1040384  }
  0x85   : > { %v258_v47 = vsel %vm257_vm0, %v256_v45, 1.0 }
  0x8a   : > { %v321_v27 = vpop.permute.xlu0 %320  ;;  %v315_v28 = vpop.permute.xlu1 %314 }
  0x8b   : > { %vm339_vm1 = vcmp.eq.s32.totalorder %v321_v27, %v649_v19  ;;  %vm337_vm4 = vcmp.eq.s32.totalorder %v315_v28, %v649_v19  ;;  %v282_v44 = vpop.permute.xlu2 %281 }
  0x8c   : > { %508 = vmatpush.msk.msra.mxu0 %vm339_vm1, %v581_v22  ;;  %vm326_vm15 = vcmp.eq.s32.totalorder %v282_v44, %v649_v19  ;;  %vm259_vm1 = vcmask 1041408  }
  0x8e   : > { %509 = vmatpush.msk.msra.mxu0 %vm338_vm3, %v581_v22 }
  0x90   : > { %510 = vmatpush.msk.msra.mxu0 %vm337_vm4, %v581_v22 }
  0x92   : > { %511 = vmatpush.msk.msra.mxu0 %vm336_vm5, %v581_v22  ;;  %v306_v32 = vpop.permute.xlu0 %305  ;;  %v303_v33 = vpop.permute.xlu1 %302 }
  0x93   : > { %vm334_vm7 = vcmp.eq.s32.totalorder %v306_v32, %v649_v19  ;;  %vm333_vm8 = vcmp.eq.s32.totalorder %v303_v33, %v649_v19 }
  0x94   : > { %512 = vmatpush.msk.msra.mxu0 %vm335_vm6, %v581_v22 }
  0x96   : > { %513 = vmatpush.msk.msra.mxu0 %vm334_vm7, %v581_v22 }
  0x98   : > { %514 = vmatpush.msk.msra.mxu0 %vm333_vm8, %v581_v22 }
  0x9a   : > { %515 = vmatpush.msk.msra.mxu0 %vm332_vm9, %v581_v22  ;;  %v297_v37 = vpop.permute.xlu0 %296  ;;  %v294_v38 = vpop.permute.xlu1 %293 }
  0x9b   : > { %vm331_vm10 = vcmp.eq.s32.totalorder %v297_v37, %v649_v19  ;;  %vm330_vm11 = vcmp.eq.s32.totalorder %v294_v38, %v649_v19 }
  0x9c   : > { %516 = vmatpush.msk.msra.mxu0 %vm331_vm10, %v581_v22 }
  0x9e   : > { %517 = vmatpush.msk.msra.mxu0 %vm330_vm11, %v581_v22 }
  0xa0   : > { %518 = vmatpush.msk.msra.mxu0 %vm329_vm12, %v581_v22 }
  0xa2   : > { %v288_v41 = vpop.permute.xlu0 %287  ;;  %v285_v42 = vpop.permute.xlu1 %284 }
  0xa3   : > { %vm328_vm13 = vcmp.eq.s32.totalorder %v288_v41, %v649_v19  ;;  %vm327_vm14 = vcmp.eq.s32.totalorder %v285_v42, %v649_v19 }
  0xa4   : > { %519 = vmatpush.msk.msra.mxu0 %vm328_vm13, %v581_v22 }
  0xa6   : > { %520 = vmatpush.msk.msra.mxu0 %vm327_vm14, %v581_v22 }
  0xa8   : > { %521 = vmatpush.msk.msra.mxu0 %vm326_vm15, %v581_v22 }
  0xaa   : > { %v279_v46 = vpop.permute.xlu0 %278 }
  0xab   : > { %vm325_vm2 = vcmp.eq.s32.totalorder %v279_v46, %v649_v19 }
  0xac   : > { %522 = vmatpush.msk.msra.mxu0 %vm325_vm2, %v581_v22 }
  0xad   : > { %523 = vmatmul.msk.f32.vlgmr.msra.gmra.mxu0 %vm259_vm1, %v258_v47 }
 0x12a   : > { %v391_v48 = vpop.f32.mrf.mxu0 }
 0x12b   : > { %395 = vst [vmem:[%s237_s4] sm:$0xff] %v391_v48 }
 0x12c PF: > { %s13_s14 = sadd.s32 1, %s578_s14   ;;  %s690_s12 = smov %s574_s13 }
 0x12d   : > { %p10_p6 = scmp.ge.s32.totalorder %s13_s14, 4   ;;  %s691_s13 = smov %s693_s15 }
 0x12f   :  { %12 = sbr.rel (!%p10_p6) target bundleno = 2 (0x2), region = 72 }

</bundles_post_ra>
